<compile_context>
chip_gen: v7x
topology: tpu7x:2x2x1
jax: 0.10.0
libtpu: 0.0.40
codegen_flags: <defaults>
</compile_context>

<pallas_src>
import functools

import jax
import jax.numpy as jnp
from jax.experimental import pallas as pl
from jax.experimental.pallas import tpu as pltpu

_LANE = 128
_SUBLANE = 8
_NEG_MASK = -1e30  # masks non-softmax lanes (exp -> 0)


def _round_up(n, m):
    return ((n + m - 1) // m) * m


def _fqf_kernel(x_ref, w1_ref, b1_ref, w2_ref, b2_ref, out_ref, *,
                oq, h_pad, f_off, packed, approx_recip):
    # ---- fused first layer: both heads share x -> one MXU matmul, f32 acc ----
    h = jnp.dot(x_ref[...], w1_ref[...], preferred_element_type=jnp.float32)
    h = jnp.maximum(h + b1_ref[...], 0.0).astype(w2_ref.dtype)

    def softmax_lanes(logits, lo, hi):
        # Softmax restricted to lanes [lo, hi); matches PyTorch Softmax(dim=-1)
        # over the flat O*Q axis (applied BEFORE the .view).
        lane = jax.lax.broadcasted_iota(jnp.int32, logits.shape, 1)
        mask = (lane >= lo) & (lane < hi)
        masked = jnp.where(mask, logits, _NEG_MASK)
        m = jnp.max(masked, axis=-1, keepdims=True)
        e = jnp.where(mask, jnp.exp(masked - m), 0.0)
        denom = jnp.sum(e, axis=-1, keepdims=True)
        return e * pl.reciprocal(denom, approx=approx_recip), mask

    if packed:
        # Single (2*h_pad, 128) matmul: quantiles in lanes [0, oq), fraction
        # logits in lanes [f_off, f_off + oq). One lane-dense 128-wide store.
        y = jnp.dot(h, w2_ref[...], preferred_element_type=jnp.float32) + b2_ref[...]
        f, fmask = softmax_lanes(y, f_off, f_off + oq)
        out_ref[...] = jnp.where(fmask, f, y).astype(out_ref.dtype)
    else:
        # Two lane-aligned dots (no block-diagonal zero-FLOP padding).
        w2 = w2_ref[...]
        b2 = b2_ref[...]
        yq = jnp.dot(h[:, :h_pad], w2[:h_pad, :],
                     preferred_element_type=jnp.float32) + b2[0:1, :]
        yf = jnp.dot(h[:, h_pad:], w2[h_pad:, :],
                     preferred_element_type=jnp.float32) + b2[1:2, :]
        f, _ = softmax_lanes(yf, 0, oq)
        oq_pad = yq.shape[-1]
        out_ref[:, :oq_pad] = yq.astype(out_ref.dtype)
        out_ref[:, oq_pad:] = f.astype(out_ref.dtype)


def _pack_fused_params(params, hidden_size, oq, compute_dtype):
    """Build fused, lane-padded parameters from PyTorch-style per-layer params.

    w1: (H, 2*h_pad)  cols [0, half) = quantile L1, [h_pad, h_pad+half) = fraction L1
    b1: (1, 2*h_pad)  f32
    packed (2*oq <= 128):
      w2: (2*h_pad, 128)  quantile L2 -> lanes [0, oq), fraction L2 -> [oq, 2*oq)
      b2: (1, 128)        f32
    split:
      w2: (2*h_pad, oq_pad)  rows [0, h_pad) quantile L2, [h_pad, 2*h_pad) fraction L2
      b2: (2, oq_pad)        f32  (row 0 quantile bias, row 1 fraction bias)
    """
    w1q, b1q, w2q, b2q, w1f, b1f, w2f, b2f = params
    half = hidden_size // 2
    h_pad = _round_up(max(half, 1), _LANE)
    oq_pad = _round_up(oq, _LANE)
    packed = (2 * oq) <= _LANE
    cdt = compute_dtype

    # Accept both (out,) and (1, out) bias layouts (real PyTorch Linear is (out,)).
    b1q = jnp.asarray(b1q, jnp.float32).reshape(-1)
    b1f = jnp.asarray(b1f, jnp.float32).reshape(-1)
    b2q = jnp.asarray(b2q, jnp.float32).reshape(-1)
    b2f = jnp.asarray(b2f, jnp.float32).reshape(-1)

    w1 = jnp.zeros((hidden_size, 2 * h_pad), cdt)
    w1 = w1.at[:, :half].set(jnp.asarray(w1q, cdt))
    w1 = w1.at[:, h_pad:h_pad + half].set(jnp.asarray(w1f, cdt))
    b1 = jnp.zeros((1, 2 * h_pad), jnp.float32)
    b1 = b1.at[0, :half].set(b1q)
    b1 = b1.at[0, h_pad:h_pad + half].set(b1f)

    if packed:
        f_off, out_w = oq, _LANE
        w2 = jnp.zeros((2 * h_pad, _LANE), cdt)
        w2 = w2.at[:half, :oq].set(jnp.asarray(w2q, cdt))
        w2 = w2.at[h_pad:h_pad + half, f_off:f_off + oq].set(jnp.asarray(w2f, cdt))
        b2 = jnp.zeros((1, _LANE), jnp.float32)
        b2 = b2.at[0, :oq].set(b2q)
        b2 = b2.at[0, f_off:f_off + oq].set(b2f)
    else:
        f_off, out_w = 0, 2 * oq_pad
        w2 = jnp.zeros((2 * h_pad, oq_pad), cdt)
        w2 = w2.at[:half, :oq].set(jnp.asarray(w2q, cdt))
        w2 = w2.at[h_pad:h_pad + half, :oq].set(jnp.asarray(w2f, cdt))
        b2 = jnp.zeros((2, oq_pad), jnp.float32)
        b2 = b2.at[0, :oq].set(b2q)
        b2 = b2.at[1, :oq].set(b2f)

    return w1, b1, w2, b2, h_pad, f_off, packed, out_w, oq_pad


def _vmem_budget_bytes():
    """Physical VMEM with ~20% headroom for compiler scratch / semaphores."""
    try:
        cap = int(pltpu.get_tpu_info().vmem_capacity_bytes)
    except Exception:
        cap = 64 << 20  # conservative: v7x per-TensorCore VMEM
    return max(int(cap * 0.8), 32 << 20)


def fqf_reward_head_forward(x, params, num_objectives, num_quantiles, *,
                            tile_b=512, prefer_bf16=False):
    """x: (B, hidden_size).  Returns (quantiles, fractions), each (B, O, Q)."""
    B, H = x.shape
    O, Q = num_objectives, num_quantiles
    oq = O * Q

    # Optional bf16 MXU path for f32 callers (accumulation stays f32 in-kernel).
    compute_dtype = (jnp.bfloat16
                     if (prefer_bf16 and x.dtype == jnp.float32) else x.dtype)
    x = x.astype(compute_dtype)
    itemsize = jnp.dtype(compute_dtype).itemsize

    w1, b1, w2, b2, h_pad, f_off, packed, out_w, oq_pad = _pack_fused_params(
        params, H, oq, compute_dtype)

    # Sublane pack depends on dtype: 8 for f32, 16 for bf16, 32 for int8/fp8.
    pack = max(_SUBLANE, 32 // itemsize)

    budget = _vmem_budget_bytes()
    # Weights counted double-buffered so the non-Buffered(1) fallback also fits.
    weight_bytes = (2 * (w1.size + w2.size) * itemsize
                    + 2 * (b1.size + b2.size) * 4)
    per_row = 2 * (H + out_w) * itemsize          # double-buffered x + out tiles
    margin = 2 << 20
    avail = max(budget - weight_bytes - margin, per_row * pack)
    tile_max = max(pack, (avail // per_row) // pack * pack)

    b_ceil = _round_up(B, pack)
    tile = min(_round_up(min(tile_b, b_ceil), pack), tile_max)
    if b_ceil >= 2 * pack:
        # Keep >= 2 grid steps so both v7x TensorCores get work.
        tile = min(tile, _round_up((b_ceil + 1) // 2, pack))
    tile = max(tile, pack)

    b_pad = _round_up(B, tile)
    if b_pad != B:
        x = jnp.pad(x, ((0, b_pad - B), (0, 0)))

    need = weight_bytes + tile * per_row + margin
    vmem_limit = int(min(budget, max(need, 32 << 20)))

    kernel = functools.partial(
        _fqf_kernel, oq=oq, h_pad=h_pad, f_off=f_off, packed=packed,
        approx_recip=(jnp.dtype(compute_dtype) == jnp.dtype(jnp.bfloat16)))

    def make_call(weight_mode):
        kw = {} if weight_mode is None else {"pipeline_mode": weight_mode}
        return pl.pallas_call(
            kernel,
            out_shape=jax.ShapeDtypeStruct((b_pad, out_w), compute_dtype),
            grid=(b_pad // tile,),
            in_specs=[
                pl.BlockSpec((tile, H), lambda i: (i, 0)),        # x (streamed)
                pl.BlockSpec(w1.shape, lambda i: (0, 0), **kw),   # fused W1 (resident)
                pl.BlockSpec(b1.shape, lambda i: (0, 0), **kw),   # fused b1, f32
                pl.BlockSpec(w2.shape, lambda i: (0, 0), **kw),   # fused W2 (resident)
                pl.BlockSpec(b2.shape, lambda i: (0, 0), **kw),   # fused b2, f32
            ],
            out_specs=pl.BlockSpec((tile, out_w), lambda i: (i, 0)),
            compiler_params=pltpu.CompilerParams(
                dimension_semantics=("parallel",),
                vmem_limit_bytes=vmem_limit,
            ),
        )

    buffered = getattr(pl, "Buffered", None)
    try:
        mode = buffered(1) if buffered is not None else None
        out = make_call(mode)(x, w1, b1, w2, b2)
    except Exception:
        # Fallback if single-buffered pipeline_mode is unsupported on this jax.
        out = make_call(None)(x, w1, b1, w2, b2)

    quantiles = out[:B, :oq].reshape(-1, O, Q)
    if packed:
        fractions = out[:B, f_off:f_off + oq].reshape(-1, O, Q)
    else:
        fractions = out[:B, oq_pad:oq_pad + oq].reshape(-1, O, Q)
    return quantiles, fractions


def init_params(key, hidden_size, num_objectives, num_quantiles):
    """Deterministic PyTorch-Linear-style init (uniform +/- 1/sqrt(fan_in)).
    Weights stored as (in, out); biases as (1, out)."""
    half = hidden_size // 2
    oq = num_objectives * num_quantiles

    def linear(k, fan_in, fan_out):
        kw, kb = jax.random.split(k)
        bound = 1.0 / (fan_in ** 0.5)
        w = jax.random.uniform(kw, (fan_in, fan_out), jnp.float32, -bound, bound)
        b = jax.random.uniform(kb, (1, fan_out), jnp.float32, -bound, bound)
        return w, b

    k1, k2, k3, k4 = jax.random.split(key, 4)
    w1q, b1q = linear(k1, hidden_size, half)
    w2q, b2q = linear(k2, half, oq)
    w1f, b1f = linear(k3, hidden_size, half)
    w2f, b2f = linear(k4, half, oq)
    return (w1q, b1q, w2q, b2q, w1f, b1f, w2f, b2f)


def _reference(x, params):
    w1q, b1q, w2q, b2q, w1f, b1f, w2f, b2f = params
    q = jnp.maximum(x @ w1q + b1q, 0.0) @ w2q + b2q
    logits = jnp.maximum(x @ w1f + b1f, 0.0) @ w2f + b2f
    f = jax.nn.softmax(logits, axis=-1)
    return q, f


if __name__ == "__main__":
    hidden_size = 32
    num_objectives = 3
    num_quantiles = 8
    batch = 4

    key = jax.random.PRNGKey(0)
    kx, kp = jax.random.split(key)
    x = jax.random.normal(kx, (batch, hidden_size), dtype=jnp.float32)
    params = init_params(kp, hidden_size, num_objectives, num_quantiles)

    # --- exact f32 path, packed single-slab branch (2*O*Q <= 128) ---
    quantiles, fractions = fqf_reward_head_forward(
        x, params, num_objectives, num_quantiles)
    jax.block_until_ready((quantiles, fractions))

    q_ref, f_ref = _reference(x, params)
    q_ref = q_ref.reshape(-1, num_objectives, num_quantiles)
    f_ref = f_ref.reshape(-1, num_objectives, num_quantiles)
    assert quantiles.shape == (batch, num_objectives, num_quantiles)
    assert fractions.shape == (batch, num_objectives, num_quantiles)
    assert jnp.allclose(quantiles, q_ref, atol=1e-5, rtol=1e-5)
    assert jnp.allclose(fractions, f_ref, atol=1e-5, rtol=1e-5)
    assert jnp.allclose(jnp.sum(fractions, axis=(1, 2)), 1.0, atol=1e-5)

    # --- split-dot branch (2*O*Q > 128), still exact f32 ---
    O2, Q2 = 3, 40
    params2 = init_params(kp, hidden_size, O2, Q2)
    q2, f2 = fqf_reward_head_forward(x, params2, O2, Q2)
    jax.block_until_ready((q2, f2))
    q2_ref, f2_ref = _reference(x, params2)
    assert jnp.allclose(q2, q2_ref.reshape(-1, O2, Q2), atol=1e-5, rtol=1e-5)
    assert jnp.allclose(f2, f2_ref.reshape(-1, O2, Q2), atol=1e-5, rtol=1e-5)

    # --- bf16 MXU path (f32 inputs cast in-wrapper, f32 accumulation) ---
    qb, fb = fqf_reward_head_forward(
        x, params, num_objectives, num_quantiles, prefer_bf16=True)
    jax.block_until_ready((qb, fb))
    assert jnp.allclose(qb.astype(jnp.float32), q_ref, atol=0.1)
    assert jnp.allclose(jnp.sum(fb.astype(jnp.float32), axis=(1, 2)), 1.0, atol=1e-2)

    print("KERNEL_OK")
</pallas_src>

<mosaic_0001>
module attributes {stable_mosaic.version = 11 : i64} {
  func.func @_fqf_kernel(%arg0: i32, %arg1: memref<8x32xf32, #tpu.memory_space<vmem>>, %arg2: memref<32x256xf32, #tpu.memory_space<vmem>>, %arg3: memref<1x256xf32, #tpu.memory_space<vmem>>, %arg4: memref<256x128xf32, #tpu.memory_space<vmem>>, %arg5: memref<1x128xf32, #tpu.memory_space<vmem>>, %arg6: memref<8x128xf32, #tpu.memory_space<vmem>>) attributes {dimension_semantics = [#tpu.dimension_semantics<parallel>], iteration_bounds = array<i64: 1>, scalar_prefetch = 0 : i64, scratch_operands = 0 : i64, tpu.core_type = #tpu.core_type<tc>, window_params = [{transform_indices = @transform_0, window_bounds = array<i64: 8, 32>}, {pipeline_mode = #tpu.pipeline_mode<synchronous>, transform_indices = @transform_1, window_bounds = array<i64: 32, 256>}, {pipeline_mode = #tpu.pipeline_mode<synchronous>, transform_indices = @transform_2, window_bounds = array<i64: 1, 256>}, {pipeline_mode = #tpu.pipeline_mode<synchronous>, transform_indices = @transform_3, window_bounds = array<i64: 256, 128>}, {pipeline_mode = #tpu.pipeline_mode<synchronous>, transform_indices = @transform_4, window_bounds = array<i64: 1, 128>}, {transform_indices = @transform_5, window_bounds = array<i64: 8, 128>}]} {
    %c0 = arith.constant 0 : index
    %c0_0 = arith.constant 0 : index
    %0 = vector.load %arg1[%c0, %c0_0] : memref<8x32xf32, #tpu.memory_space<vmem>>, vector<8x32xf32>
    %c0_1 = arith.constant 0 : index
    %c0_2 = arith.constant 0 : index
    %1 = vector.load %arg2[%c0_1, %c0_2] : memref<32x256xf32, #tpu.memory_space<vmem>>, vector<32x256xf32>
    %cst = arith.constant dense<0.000000e+00> : vector<8x256xf32>
    %2 = tpu.matmul %0, %1, %cst {dimension_numbers = #tpu.dot_dimension_numbers<[1], [0], [0], [1], [0, 0, 1, 1], [], []>} : vector<8x32xf32>, vector<32x256xf32>, vector<8x256xf32> -> vector<8x256xf32>
    %c0_3 = arith.constant 0 : index
    %c0_4 = arith.constant 0 : index
    %3 = vector.load %arg3[%c0_3, %c0_4] : memref<1x256xf32, #tpu.memory_space<vmem>>, vector<1x256xf32>
    %4 = vector.broadcast %3 : vector<1x256xf32> to vector<8x256xf32>
    %5 = arith.addf %2, %4 : vector<8x256xf32>
    %cst_5 = arith.constant 0.000000e+00 : f32
    %6 = vector.broadcast %cst_5 : f32 to vector<8x256xf32>
    %7 = arith.maximumf %5, %6 : vector<8x256xf32>
    %c0_6 = arith.constant 0 : index
    %c0_7 = arith.constant 0 : index
    %8 = vector.load %arg4[%c0_6, %c0_7] : memref<256x128xf32, #tpu.memory_space<vmem>>, vector<256x128xf32>
    %cst_8 = arith.constant dense<0.000000e+00> : vector<8x128xf32>
    %9 = tpu.matmul %7, %8, %cst_8 {dimension_numbers = #tpu.dot_dimension_numbers<[1], [0], [0], [1], [0, 0, 1, 1], [], []>} : vector<8x256xf32>, vector<256x128xf32>, vector<8x128xf32> -> vector<8x128xf32>
    %c0_9 = arith.constant 0 : index
    %c0_10 = arith.constant 0 : index
    %10 = vector.load %arg5[%c0_9, %c0_10] : memref<1x128xf32, #tpu.memory_space<vmem>>, vector<1x128xf32>
    %11 = vector.broadcast %10 : vector<1x128xf32> to vector<8x128xf32>
    %12 = arith.addf %9, %11 : vector<8x128xf32>
    %13 = tpu.iota {dimensions = array<i32: 1>} : vector<8x128xi32>
    %c24_i32 = arith.constant 24 : i32
    %14 = vector.broadcast %c24_i32 : i32 to vector<8x128xi32>
    %15 = arith.cmpi sge, %13, %14 : vector<8x128xi32>
    %c48_i32 = arith.constant 48 : i32
    %16 = vector.broadcast %c48_i32 : i32 to vector<8x128xi32>
    %17 = arith.cmpi slt, %13, %16 : vector<8x128xi32>
    %18 = arith.andi %15, %17 : vector<8x128xi1>
    %cst_11 = arith.constant -1.000000e+30 : f32
    %19 = vector.broadcast %cst_11 : f32 to vector<8x128xf32>
    %20 = arith.select %18, %12, %19 : vector<8x128xi1>, vector<8x128xf32>
    %cst_12 = arith.constant dense<0xFF800000> : vector<8xf32>
    %21 = vector.multi_reduction <maximumf>, %20, %cst_12 [1] : vector<8x128xf32> to vector<8xf32>
    %22 = vector.shape_cast %21 : vector<8xf32> to vector<8x1xf32>
    %23 = vector.broadcast %22 : vector<8x1xf32> to vector<8x128xf32>
    %24 = arith.subf %20, %23 : vector<8x128xf32>
    %25 = math.exp %24 : vector<8x128xf32>
    %cst_13 = arith.constant 0.000000e+00 : f32
    %26 = vector.broadcast %cst_13 : f32 to vector<8x128xf32>
    %27 = arith.select %18, %25, %26 : vector<8x128xi1>, vector<8x128xf32>
    %cst_14 = arith.constant dense<0.000000e+00> : vector<8xf32>
    %28 = vector.multi_reduction <add>, %27, %cst_14 [1] : vector<8x128xf32> to vector<8xf32>
    %29 = vector.shape_cast %28 : vector<8xf32> to vector<8x1xf32>
    %30 = tpu.reciprocal %29 : vector<8x1xf32> -> vector<8x1xf32>
    %31 = vector.broadcast %30 : vector<8x1xf32> to vector<8x128xf32>
    %32 = arith.mulf %27, %31 : vector<8x128xf32>
    %33 = arith.select %18, %32, %12 : vector<8x128xi1>, vector<8x128xf32>
    %c0_15 = arith.constant 0 : index
    %c0_16 = arith.constant 0 : index
    %34 = vector.load %arg6[%c0_15, %c0_16] : memref<8x128xf32, #tpu.memory_space<vmem>>, vector<8x128xf32>
    tpu.vector_store %arg6[%c0_15, %c0_16], %33 {strides = array<i32>} : memref<8x128xf32, #tpu.memory_space<vmem>>, vector<8x128xf32>,
    return
  }
  func.func @transform_0(%arg0: i32) -> (i32, i32) {
    %c0_i32 = arith.constant 0 : i32
    %c0_i32_0 = arith.constant 0 : i32
    return %arg0, %c0_i32 : i32, i32
  }
  func.func @transform_1(%arg0: i32) -> (i32, i32) {
    %c0_i32 = arith.constant 0 : i32
    %c0_i32_0 = arith.constant 0 : i32
    %c0_i32_1 = arith.constant 0 : i32
    return %c0_i32, %c0_i32_0 : i32, i32
  }
  func.func @transform_2(%arg0: i32) -> (i32, i32) {
    %c0_i32 = arith.constant 0 : i32
    %c0_i32_0 = arith.constant 0 : i32
    %c0_i32_1 = arith.constant 0 : i32
    return %c0_i32, %c0_i32_0 : i32, i32
  }
  func.func @transform_3(%arg0: i32) -> (i32, i32) {
    %c0_i32 = arith.constant 0 : i32
    %c0_i32_0 = arith.constant 0 : i32
    %c0_i32_1 = arith.constant 0 : i32
    return %c0_i32, %c0_i32_0 : i32, i32
  }
  func.func @transform_4(%arg0: i32) -> (i32, i32) {
    %c0_i32 = arith.constant 0 : i32
    %c0_i32_0 = arith.constant 0 : i32
    %c0_i32_1 = arith.constant 0 : i32
    return %c0_i32, %c0_i32_0 : i32, i32
  }
  func.func @transform_5(%arg0: i32) -> (i32, i32) {
    %c0_i32 = arith.constant 0 : i32
    %c0_i32_0 = arith.constant 0 : i32
    return %arg0, %c0_i32 : i32, i32
  }
}

module attributes {stable_mosaic.version = 11 : i64} {
  func.func @_fqf_kernel(%arg0: i32, %arg1: memref<8x32xf32, #tpu.memory_space<vmem>>, %arg2: memref<32x256xf32, #tpu.memory_space<vmem>>, %arg3: memref<1x256xf32, #tpu.memory_space<vmem>>, %arg4: memref<256x128xf32, #tpu.memory_space<vmem>>, %arg5: memref<1x128xf32, #tpu.memory_space<vmem>>, %arg6: memref<8x128xf32, #tpu.memory_space<vmem>>) attributes {dimension_semantics = [#tpu.dimension_semantics<parallel>], iteration_bounds = array<i64: 1>, scalar_prefetch = 0 : i64, scratch_operands = 0 : i64, tpu.core_type = #tpu.core_type<tc>, window_params = [{transform_indices = @transform_0, window_bounds = array<i64: 8, 32>}, {pipeline_mode = #tpu.pipeline_mode<synchronous>, transform_indices = @transform_1, window_bounds = array<i64: 32, 256>}, {pipeline_mode = #tpu.pipeline_mode<synchronous>, transform_indices = @transform_2, window_bounds = array<i64: 1, 256>}, {pipeline_mode = #tpu.pipeline_mode<synchronous>, transform_indices = @transform_3, window_bounds = array<i64: 256, 128>}, {pipeline_mode = #tpu.pipeline_mode<synchronous>, transform_indices = @transform_4, window_bounds = array<i64: 1, 128>}, {transform_indices = @transform_5, window_bounds = array<i64: 8, 128>}]} {
    %c0 = arith.constant 0 : index
    %c0_0 = arith.constant 0 : index
    %0 = vector.load %arg1[%c0, %c0_0] : memref<8x32xf32, #tpu.memory_space<vmem>>, vector<8x32xf32>
    %c0_1 = arith.constant 0 : index
    %c0_2 = arith.constant 0 : index
    %1 = vector.load %arg2[%c0_1, %c0_2] : memref<32x256xf32, #tpu.memory_space<vmem>>, vector<32x256xf32>
    %cst = arith.constant dense<0.000000e+00> : vector<8x256xf32>
    %2 = tpu.matmul %0, %1, %cst {dimension_numbers = #tpu.dot_dimension_numbers<[1], [0], [0], [1], [0, 0, 1, 1], [], []>} : vector<8x32xf32>, vector<32x256xf32>, vector<8x256xf32> -> vector<8x256xf32>
    %c0_3 = arith.constant 0 : index
    %c0_4 = arith.constant 0 : index
    %3 = vector.load %arg3[%c0_3, %c0_4] : memref<1x256xf32, #tpu.memory_space<vmem>>, vector<1x256xf32>
    %4 = vector.broadcast %3 : vector<1x256xf32> to vector<8x256xf32>
    %5 = arith.addf %2, %4 : vector<8x256xf32>
    %cst_5 = arith.constant 0.000000e+00 : f32
    %6 = vector.broadcast %cst_5 : f32 to vector<8x256xf32>
    %7 = arith.maximumf %5, %6 : vector<8x256xf32>
    %c0_6 = arith.constant 0 : index
    %c0_7 = arith.constant 0 : index
    %8 = vector.load %arg4[%c0_6, %c0_7] : memref<256x128xf32, #tpu.memory_space<vmem>>, vector<256x128xf32>
    %cst_8 = arith.constant dense<0.000000e+00> : vector<8x128xf32>
    %9 = tpu.matmul %7, %8, %cst_8 {dimension_numbers = #tpu.dot_dimension_numbers<[1], [0], [0], [1], [0, 0, 1, 1], [], []>} : vector<8x256xf32>, vector<256x128xf32>, vector<8x128xf32> -> vector<8x128xf32>
    %c0_9 = arith.constant 0 : index
    %c0_10 = arith.constant 0 : index
    %10 = vector.load %arg5[%c0_9, %c0_10] : memref<1x128xf32, #tpu.memory_space<vmem>>, vector<1x128xf32>
    %11 = vector.broadcast %10 : vector<1x128xf32> to vector<8x128xf32>
    %12 = arith.addf %9, %11 : vector<8x128xf32>
    %13 = tpu.iota {dimensions = array<i32: 1>} : vector<8x128xi32>
    %c24_i32 = arith.constant 24 : i32
    %14 = vector.broadcast %c24_i32 : i32 to vector<8x128xi32>
    %15 = arith.cmpi sge, %13, %14 : vector<8x128xi32>
    %c48_i32 = arith.constant 48 : i32
    %16 = vector.broadcast %c48_i32 : i32 to vector<8x128xi32>
    %17 = arith.cmpi slt, %13, %16 : vector<8x128xi32>
    %18 = arith.andi %15, %17 : vector<8x128xi1>
    %cst_11 = arith.constant -1.000000e+30 : f32
    %19 = vector.broadcast %cst_11 : f32 to vector<8x128xf32>
    %20 = arith.select %18, %12, %19 : vector<8x128xi1>, vector<8x128xf32>
    %cst_12 = arith.constant dense<0xFF800000> : vector<8xf32>
    %21 = vector.multi_reduction <maximumf>, %20, %cst_12 [1] : vector<8x128xf32> to vector<8xf32>
    %22 = vector.shape_cast %21 : vector<8xf32> to vector<8x1xf32>
    %23 = vector.broadcast %22 : vector<8x1xf32> to vector<8x128xf32>
    %24 = arith.subf %20, %23 : vector<8x128xf32>
    %25 = math.exp %24 : vector<8x128xf32>
    %cst_13 = arith.constant 0.000000e+00 : f32
    %26 = vector.broadcast %cst_13 : f32 to vector<8x128xf32>
    %27 = arith.select %18, %25, %26 : vector<8x128xi1>, vector<8x128xf32>
    %cst_14 = arith.constant dense<0.000000e+00> : vector<8xf32>
    %28 = vector.multi_reduction <add>, %27, %cst_14 [1] : vector<8x128xf32> to vector<8xf32>
    %29 = vector.shape_cast %28 : vector<8xf32> to vector<8x1xf32>
    %30 = tpu.reciprocal %29 : vector<8x1xf32> -> vector<8x1xf32>
    %31 = vector.broadcast %30 : vector<8x1xf32> to vector<8x128xf32>
    %32 = arith.mulf %27, %31 : vector<8x128xf32>
    %33 = arith.select %18, %32, %12 : vector<8x128xi1>, vector<8x128xf32>
    %c0_15 = arith.constant 0 : index
    %c0_16 = arith.constant 0 : index
    %34 = vector.load %arg6[%c0_15, %c0_16] : memref<8x128xf32, #tpu.memory_space<vmem>>, vector<8x128xf32>
    tpu.vector_store %arg6[%c0_15, %c0_16], %33 {strides = array<i32>} : memref<8x128xf32, #tpu.memory_space<vmem>>, vector<8x128xf32>,
    return
  }
  func.func @transform_0(%arg0: i32) -> (i32, i32) {
    %c0_i32 = arith.constant 0 : i32
    %c0_i32_0 = arith.constant 0 : i32
    return %arg0, %c0_i32 : i32, i32
  }
  func.func @transform_1(%arg0: i32) -> (i32, i32) {
    %c0_i32 = arith.constant 0 : i32
    %c0_i32_0 = arith.constant 0 : i32
    %c0_i32_1 = arith.constant 0 : i32
    return %c0_i32, %c0_i32_0 : i32, i32
  }
  func.func @transform_2(%arg0: i32) -> (i32, i32) {
    %c0_i32 = arith.constant 0 : i32
    %c0_i32_0 = arith.constant 0 : i32
    %c0_i32_1 = arith.constant 0 : i32
    return %c0_i32, %c0_i32_0 : i32, i32
  }
  func.func @transform_3(%arg0: i32) -> (i32, i32) {
    %c0_i32 = arith.constant 0 : i32
    %c0_i32_0 = arith.constant 0 : i32
    %c0_i32_1 = arith.constant 0 : i32
    return %c0_i32, %c0_i32_0 : i32, i32
  }
  func.func @transform_4(%arg0: i32) -> (i32, i32) {
    %c0_i32 = arith.constant 0 : i32
    %c0_i32_0 = arith.constant 0 : i32
    %c0_i32_1 = arith.constant 0 : i32
    return %c0_i32, %c0_i32_0 : i32, i32
  }
  func.func @transform_5(%arg0: i32) -> (i32, i32) {
    %c0_i32 = arith.constant 0 : i32
    %c0_i32_0 = arith.constant 0 : i32
    return %arg0, %c0_i32 : i32, i32
  }
}

</mosaic_0001>

<bundles_post_ra>
// kernel: tpu_custom_call.1
= control target key start
LH: loop header
LB: loop body
LE: loop exit
PB: predicated region body
PF: predicated region fallthrough
CT: control target
= control target key end

     0   :  { %10 = vsyncpa [#allocation3], 0  ;;  %s588_s0 = inlined_call_operand.hbm [shape: f32[8,32], index: 0, kind: input, shape index: {}]   ;;  %s589_s1 = inlined_call_operand.hbm [shape: f32[32,256], index: 1, kind: input, shape index: {}]   ;;  %s590_s2 = inlined_call_operand.vmem [shape: f32[1,256], index: 2, kind: input, shape index: {}]   ;;  %s591_s3 = inlined_call_operand.hbm [shape: f32[256,128], index: 3, kind: input, shape index: {}]   ;;  %s592_s4 = inlined_call_operand.vmem [shape: f32[1,128], index: 4, kind: input, shape index: {}]   ;;  %s593_s5 = inlined_call_operand.hbm [shape: f32[8,128], index: 5, kind: output, shape index: {}]  }
   0x1   :  { %11 = vsyncpa [#allocation6], 0 }
   0x2   :  { %12 = vsyncpa [#allocation4], 0  ;;  %s485_s18 = smov [#allocation5]   ;;  %s391_s22 = scalar_lea.hbm %s589_s1, 1024 }
   0x3   :  { %s28_s19 = sshll.u32 %s485_s18, 4  ;;  %p392_p0 = scmp.ne.s32.totalorder %s589_s1, %s391_s22  ;;  %s29_s19 = int_to_ptr.vmem [resolvable:$true] %s28_s19 }
   0x4   :  { %p395_p1 = scmp.lt.u32.totalorder %s391_s22, %s589_s1 }
   0x6   :  { %p397_p2 = pnand %p395_p1, %p392_p0 }
   0x8   :  { %400 = shalt.err (!%p397_p2)
}
   0x9   :  { %s401_s27 = scalar_lea.vmem %s29_s19, 1024  ;;  %p406_p4 = scmp.lt.s32.totalorder %s29_s19, %s29_s19 }
   0xa   :  { %p402_p3 = scmp.ne.s32.totalorder %s29_s19, %s401_s27  ;;  %p407_p5 = scmp.lt.s32.totalorder %s401_s27, %s401_s27 }
   0xc   :  { %p408_p6 = por %p407_p5, %p406_p4 }
   0xe   :  { %p409_p7 = pnand %p408_p6, %p402_p3 }
  0x10   :  { %412 = shalt.err (!%p409_p7)
}
  0x11   :  { %s486_s28 = smov 256   ;;  %s487_s29 = smov 16  }
  0x12   :  { %34 = dma.hbm_to_vmem [thread:$0]  %s589_s1, 1024, %s29_s19, [#allocation6], %s486_s28, %s486_s28, %s487_s29  }
  0x13   :  { %s488_s7 = smov [#allocation2]   ;;  %s489_s9 = smov [#allocation7]  }
  0x14   :  { %s19_s8 = sshll.u32 %s488_s7, 4  ;;  %s42_s10 = sshll.u32 %s489_s9, 4  ;;  %s20_s8 = int_to_ptr.vmem [resolvable:$true] %s19_s8  ;;  %s43_s10 = int_to_ptr.vmem [resolvable:$true] %s42_s10 }
  0x15   :  { %s413_s13 = scalar_lea.hbm %s588_s0, 128 }
  0x16   :  { %p414_p8 = scmp.ne.s32.totalorder %s588_s0, %s413_s13  ;;  %p417_p9 = scmp.lt.u32.totalorder %s413_s13, %s588_s0 }
  0x18   :  { %p419_p10 = pnand %p417_p9, %p414_p8 }
  0x1a   :  { %422 = shalt.err (!%p419_p10)
}
  0x1b   :  { %s423_s1 = scalar_lea.vmem %s20_s8, 128  ;;  %p428_p12 = scmp.lt.s32.totalorder %s20_s8, %s20_s8 }
  0x1c   :  { %p424_p11 = scmp.ne.s32.totalorder %s20_s8, %s423_s1  ;;  %p429_p13 = scmp.lt.s32.totalorder %s423_s1, %s423_s1 }
  0x1e   :  { %p430_p0 = por %p429_p13, %p428_p12 }
  0x20   :  { %p431_p1 = pnand %p430_p0, %p424_p11 }
  0x22   :  { %434 = shalt.err (!%p431_p1)
}
  0x23   :  { %22 = dma.hbm_to_vmem [thread:$0]  %s588_s0, 128, %s20_s8, [#allocation3]  }
  0x24   :  { %s435_s22 = scalar_lea.hbm %s591_s3, 4096 }
  0x25   :  { %p436_p2 = scmp.ne.s32.totalorder %s591_s3, %s435_s22  ;;  %p439_p3 = scmp.lt.u32.totalorder %s435_s22, %s591_s3 }
  0x27   :  { %p441_p4 = pnand %p439_p3, %p436_p2 }
  0x29   :  { %444 = shalt.err (!%p441_p4)
}
  0x2a   :  { %s445_s27 = scalar_lea.vmem %s43_s10, 4096  ;;  %p450_p6 = scmp.lt.s32.totalorder %s43_s10, %s43_s10 }
  0x2b   :  { %p446_p5 = scmp.ne.s32.totalorder %s43_s10, %s445_s27  ;;  %p451_p7 = scmp.lt.s32.totalorder %s445_s27, %s445_s27 }
  0x2d   :  { %p452_p8 = por %p451_p7, %p450_p6 }
  0x2f   :  { %p453_p9 = pnand %p452_p8, %p446_p5 }
  0x31   :  { %456 = shalt.err (!%p453_p9)
}
  0x32   :  { %s490_s0 = smov 128   ;;  %s491_s28 = smov 8  }
  0x33   :  { %48 = dma.hbm_to_vmem [thread:$0]  %s591_s3, 4096, %s43_s10, [#allocation6], %s490_s0, %s490_s0, %s491_s28  }
  0x34   :  { %479 = dma.done.wait [#allocation3], 128  }
  0x35   :  { %480 = vsyncadd [#allocation3], 4294967168 }
  0x36   :  { %481 = dma.done.wait [#allocation6], 5120  }
  0x37   :  { %482 = vsyncadd [#allocation6], 4294962176  ;;  %v492_v0 = vmov 0.0   ;;  %v62_v1 = vld [vmem:[#allocation5 + $0x8] sm:$0xff]  ;;  %v64_v2 = vld [vmem:[#allocation5 + $0x18] sm:$0xff]  ;;  %vm81_vm0 = vcmask 261120   ;;  %v71_v62 = vlaneseq }
  0x38   :  { %149 = vmatprep.mubr.f32.mxu0 %v492_v0  ;;  %v61_v3 = vld [vmem:[#allocation5] sm:$0xff]  ;;  %v338_v4 = vpack.c.bf16 %v64_v2, %v62_v1  ;;  %v63_v5 = vld [vmem:[#allocation5 + $0x10] sm:$0xff]  ;;  %v66_v6 = vld [vmem:[#allocation5 + $0x28] sm:$0xff] }
  0x39   :  { %v68_v7 = vld [vmem:[#allocation5 + $0x38] sm:$0xff]  ;;  %v340_v8 = vpack.c.bf16 %v63_v5, %v61_v3  ;;  %v65_v10 = vld [vmem:[#allocation5 + $0x20] sm:$0xff]  ;;  %v67_v11 = vld [vmem:[#allocation5 + $0x30] sm:$0xff]  ;;  %v72_v63 = vshrl.u32 %v71_v62, 7 }
  0x3a   :  { %v342_v9 = vpack.c.bf16 %v68_v7, %v66_v6  ;;  %339 = vmatprep.subr.bf16.mxu0 %v338_v4  ;;  %v174_v12 = vld [vmem:[#allocation7 + $0x80] sm:$0xff]  ;;  %v175_v13 = vld [vmem:[#allocation7 + $0x88] sm:$0xff]  ;;  %v344_v15 = vpack.c.bf16 %v67_v11, %v65_v10  ;;  %v176_v18 = vld [vmem:[#allocation7 + $0x90] sm:$0xff]  ;;  %v268_v11 = vand.u32 127, %v71_v62 }
  0x3b   :  { %v158_v14 = vld [vmem:[#allocation7] sm:$0xff]  ;;  %341 = vmatpush1.bf16.msra.mxu0 %v340_v8  ;;  %v346_v16 = vpack.c.bf16 %v175_v13, %v174_v12  ;;  %v159_v17 = vld [vmem:[#allocation7 + $0x8] sm:$0xff]  ;;  %v177_v19 = vld [vmem:[#allocation7 + $0x98] sm:$0xff]  ;;  %v73_v0 = vsub.s32 0, %v72_v63  ;;  %v77_v2 = vsub.s32 1, %v72_v63 }
  0x3c   :  { %343 = vmatprep.subr.bf16.mxu0 %v342_v9  ;;  %v348_v20 = vpack.c.bf16 %v159_v17, %v158_v14  ;;  %v350_v21 = vpack.c.bf16 %v177_v19, %v176_v18  ;;  %v160_v22 = vld [vmem:[#allocation7 + $0x10] sm:$0xff]  ;;  %v161_v23 = vld [vmem:[#allocation7 + $0x18] sm:$0xff]  ;;  %v178_v24 = vld [vmem:[#allocation7 + $0xa0] sm:$0xff]  ;;  %vm269_vm1 = vcmp.ge.s32.totalorder %v268_v11, 24  ;;  %vm270_vm2 = vcmp.lt.s32.totalorder %v268_v11, 48 }
  0x3d   :  { %347 = vmatprep.subr.bf16.mxu1 %v346_v16  ;;  %v179_v25 = vld [vmem:[#allocation7 + $0xa8] sm:$0xff]  ;;  %v352_v26 = vpack.c.bf16 %v161_v23, %v160_v22  ;;  %v60_v27 = vld [vmem:[#allocation2] sm:$0xff]  ;;  %v162_v29 = vld [vmem:[#allocation7 + $0x20] sm:$0xff] }
  0x3e   :  { %349 = vmatpush3.bf16.msra.mxu1 %v348_v20  ;;  %v354_v28 = vpack.c.bf16 %v179_v25, %v178_v24  ;;  %v163_v30 = vld [vmem:[#allocation7 + $0x28] sm:$0xff]  ;;  %v180_v31 = vld [vmem:[#allocation7 + $0xb0] sm:$0xff]  ;;  %v181_v32 = vld [vmem:[#allocation7 + $0xb8] sm:$0xff] }
  0x3f   :  { %345 = vmatpush1.bf16.msra.mxu0 %v344_v15  ;;  %351 = vmatprep.subr.bf16.mxu1 %v350_v21  ;;  %v356_v33 = vpack.c.bf16 %v163_v30, %v162_v29  ;;  %v358_v34 = vpack.c.bf16 %v181_v32, %v180_v31  ;;  %v164_v35 = vld [vmem:[#allocation7 + $0x30] sm:$0xff]  ;;  %v165_v36 = vld [vmem:[#allocation7 + $0x38] sm:$0xff]  ;;  %v182_v37 = vld [vmem:[#allocation7 + $0xc0] sm:$0xff] }
  0x40   :  { %v183_v38 = vld [vmem:[#allocation7 + $0xc8] sm:$0xff]  ;;  %v360_v39 = vpack.c.bf16 %v165_v36, %v164_v35  ;;  %v166_v41 = vld [vmem:[#allocation7 + $0x40] sm:$0xff]  ;;  %v184_v43 = vld [vmem:[#allocation7 + $0xd0] sm:$0xff] }
  0x41   :  { %v362_v40 = vpack.c.bf16 %v183_v38, %v182_v37  ;;  %v167_v42 = vld [vmem:[#allocation7 + $0x48] sm:$0xff]  ;;  %v185_v44 = vld [vmem:[#allocation7 + $0xd8] sm:$0xff]  ;;  %v168_v47 = vld [vmem:[#allocation7 + $0x50] sm:$0xff] }
  0x42   :  { %301 = vmatmul.mubr.msk.f32.vlgmr.msra.gmra.mrb[0].mxu0 %vm81_vm0, %v60_v27  ;;  %353 = vmatpush3.bf16.msra.mxu1 %v352_v26  ;;  %v364_v45 = vpack.c.bf16 %v167_v42, %v166_v41  ;;  %v366_v46 = vpack.c.bf16 %v185_v44, %v184_v43  ;;  %v169_v48 = vld [vmem:[#allocation7 + $0x58] sm:$0xff]  ;;  %v186_v49 = vld [vmem:[#allocation7 + $0xe0] sm:$0xff]  ;;  %v187_v50 = vld [vmem:[#allocation7 + $0xe8] sm:$0xff] }
  0x43   :  { %355 = vmatprep.subr.bf16.mxu1 %v354_v28  ;;  %v368_v51 = vpack.c.bf16 %v169_v48, %v168_v47  ;;  %v370_v52 = vpack.c.bf16 %v187_v50, %v186_v49  ;;  %v170_v53 = vld [vmem:[#allocation7 + $0x60] sm:$0xff]  ;;  %v171_v54 = vld [vmem:[#allocation7 + $0x68] sm:$0xff]  ;;  %v188_v56 = vld [vmem:[#allocation7 + $0xf0] sm:$0xff] }
  0x44   :  { %v372_v55 = vpack.c.bf16 %v171_v54, %v170_v53  ;;  %v189_v57 = vld [vmem:[#allocation7 + $0xf8] sm:$0xff]  ;;  %v172_v59 = vld [vmem:[#allocation7 + $0x70] sm:$0xff]  ;;  %vm566_vm3 = vmand %vm269_vm1, %vm270_vm2 }
  0x45   :  { %v374_v58 = vpack.c.bf16 %v189_v57, %v188_v56  ;;  %v173_v60 = vld [vmem:[#allocation7 + $0x78] sm:$0xff] }
  0x46   :  { %357 = vmatpush3.bf16.msra.mxu1 %v356_v33  ;;  %v376_v61 = vpack.c.bf16 %v173_v60, %v172_v59  ;;  %v69_v1 = vld [vmem:[%s590_s2] sm:$0x3]  ;;  %s493_s2 = smov [#allocation8]  }
  0x47   :  { %359 = vmatprep.subr.bf16.mxu1 %v358_v34  ;;  %v74_v3 = vrot.slane %v69_v1, %v73_v0  ;;  %v78_v4 = vrot.slane %v69_v1, %v77_v2  ;;  %v302_v14 = vld [vmem:[%s592_s4] ss:$0 sm:$0xff]  ;;  %s291_s4 = sshll.u32 %s493_s2, 4  ;;  %s292_s4 = int_to_ptr.vmem [resolvable:$true] %s291_s4 }
  0x48   :  { %s457_s9 = scalar_lea.vmem %s292_s4, 128  ;;  %p462_p11 = scmp.lt.s32.totalorder %s292_s4, %s292_s4 }
  0x49   :  { %p458_p10 = scmp.ne.s32.totalorder %s292_s4, %s457_s9  ;;  %p463_p12 = scmp.lt.s32.totalorder %s457_s9, %s457_s9 }
  0x4a   :  { %361 = vmatpush3.bf16.msra.mxu1 %v360_v39 }
  0x4b   :  { %363 = vmatprep.subr.bf16.mxu1 %v362_v40  ;;  %p464_p13 = por %p463_p12, %p462_p11 }
  0x4d   :  { %p465_p0 = pnand %p464_p13, %p458_p10 }
  0x4e   :  { %365 = vmatpush3.bf16.msra.mxu1 %v364_v45 }
  0x4f   :  { %367 = vmatprep.subr.bf16.mxu1 %v366_v46 }
  0x52   :  { %369 = vmatpush3.bf16.msra.mxu1 %v368_v51 }
  0x53   :  { %371 = vmatprep.subr.bf16.mxu1 %v370_v52 }
  0x56   :  { %373 = vmatpush3.bf16.msra.mxu1 %v372_v55 }
  0x57   :  { %375 = vmatprep.subr.bf16.mxu1 %v374_v58 }
  0x5a   :  { %377 = vmatpush3.bf16.msra.mxu1 %v376_v61 }
 0x115   :  { %v151_v5 = vpop.f32.mrb[0].mxu0 }
 0x116   :  { %v152_v6 = vadd.f32 %v151_v5, %v74_v3  ;;  %v153_v7 = vpop.f32.mrb[1].mxu0 }
 0x117   :  { %v154_v8 = vadd.f32 %v153_v7, %v78_v4 }
 0x118   :  { %v156_v10 = vmax.f32 %v152_v6, 0.0 }
 0x119   :  { %v157_v9 = vmax.f32 %v154_v8, 0.0 }
 0x11b   :  { %261 = vmatprep.mubr.f32.mxu1 %v157_v9 }
 0x11c   :  { %262 = vmatmul.mubr.f32.vlgmr.msra.gmra.mrb[0].mxu1 %v156_v10 }
 0x1ef   :  { %v335_v12 = vpop.f32.mrb[0].mxu1 }
 0x1f0   :  { %v336_v13 = vpop.f32.mrb[1].mxu1 }
 0x1f1   :  { %v337_v15 = vadd.f32 %v336_v13, %v335_v12 }
 0x1f3   :  { %v264_v17 = vadd.f32 %v337_v15, %v302_v14 }
 0x1f5   :  { %v272_v18 = vsel %vm566_vm3, %v264_v17, -1e+30 }
 0x1f6   :  { %273 = vmax.xlane.f32.xlu0 %v272_v18 }
 0x283   :  { %v274_v19 = vpop.xlane.xlu0 %273 }
 0x284   :  { %v275_v20 = vsub.f32 %v272_v18, %v274_v19 }
 0x286   :  { %v276_v21 = vmul.f32 1.442695, %v275_v20 }
 0x288   :  { %387 = vpow2.f32 %v276_v21 }
 0x292   :  { %v388_v22 = vpop.eup %387 }
 0x293   :  { %v278_v23 = vsel %vm566_vm3, %v388_v22, 0.0 }
 0x294   :  { %279 = vadd.xlane.f32.xlu0 %v278_v23 }
 0x321   :  { %v280_v24 = vpop.xlane.xlu0 %279 }
 0x322   :  { %389 = vrcp.f32 %v280_v24 }
 0x32c   :  { %v390_v25 = vpop.eup %389 }
 0x32d   :  { %v282_v26 = vmul.f32 %v390_v25, %v278_v23 }
 0x32f   :  { %v283_v27 = vsel %vm566_vm3, %v282_v26, %v264_v17 }
 0x330   :  { %284 = vst [vmem:[#allocation8] sm:$0xff] %v283_v27 }
 0x331   :  { %468 = shalt.err (!%p465_p0)
}
 0x332   :  { %s469_s12 = scalar_lea.hbm %s593_s5, 128 }
 0x333   :  { %p470_p1 = scmp.ne.s32.totalorder %s593_s5, %s469_s12  ;;  %p473_p2 = scmp.lt.u32.totalorder %s469_s12, %s593_s5 }
 0x335   :  { %p475_p3 = pnand %p473_p2, %p470_p1 }
 0x337   :  { %478 = shalt.err (!%p475_p3)
}
 0x338   :  { %294 = dma.vmem_to_hbm [thread:$0]  %s292_s4, 128, %s593_s5, [#allocation4]  }
 0x339   :  { %483 = dma.done.wait [#allocation4], 128  }
 0x33a   :  { %484 = vsyncadd [#allocation4], 4294967168 }
 0x33b   :  { %298 = vsyncpa [#allocation3], 1 }
 0x33c   :  { %299 = vsyncpa [#allocation6], 1 }
 0x33d   :  { %300 = vsyncpa [#allocation4], 1 }

// kernel: tpu_custom_call.1
= control target key start
LH: loop header
LB: loop body
LE: loop exit
PB: predicated region body
PF: predicated region fallthrough
CT: control target
= control target key end

     0   :  { %10 = vsyncpa [#allocation3], 0  ;;  %s588_s0 = inlined_call_operand.hbm [shape: f32[8,32], index: 0, kind: input, shape index: {}]   ;;  %s589_s1 = inlined_call_operand.hbm [shape: f32[32,256], index: 1, kind: input, shape index: {}]   ;;  %s590_s2 = inlined_call_operand.vmem [shape: f32[1,256], index: 2, kind: input, shape index: {}]   ;;  %s591_s3 = inlined_call_operand.hbm [shape: f32[256,128], index: 3, kind: input, shape index: {}]   ;;  %s592_s4 = inlined_call_operand.vmem [shape: f32[1,128], index: 4, kind: input, shape index: {}]   ;;  %s593_s5 = inlined_call_operand.hbm [shape: f32[8,128], index: 5, kind: output, shape index: {}]  }
   0x1   :  { %11 = vsyncpa [#allocation6], 0 }
   0x2   :  { %12 = vsyncpa [#allocation4], 0  ;;  %s485_s18 = smov [#allocation5]   ;;  %s391_s22 = scalar_lea.hbm %s589_s1, 1024 }
   0x3   :  { %s28_s19 = sshll.u32 %s485_s18, 4  ;;  %p392_p0 = scmp.ne.s32.totalorder %s589_s1, %s391_s22  ;;  %s29_s19 = int_to_ptr.vmem [resolvable:$true] %s28_s19 }
   0x4   :  { %p395_p1 = scmp.lt.u32.totalorder %s391_s22, %s589_s1 }
   0x6   :  { %p397_p2 = pnand %p395_p1, %p392_p0 }
   0x8   :  { %400 = shalt.err (!%p397_p2)
}
   0x9   :  { %s401_s27 = scalar_lea.vmem %s29_s19, 1024  ;;  %p406_p4 = scmp.lt.s32.totalorder %s29_s19, %s29_s19 }
   0xa   :  { %p402_p3 = scmp.ne.s32.totalorder %s29_s19, %s401_s27  ;;  %p407_p5 = scmp.lt.s32.totalorder %s401_s27, %s401_s27 }
   0xc   :  { %p408_p6 = por %p407_p5, %p406_p4 }
   0xe   :  { %p409_p7 = pnand %p408_p6, %p402_p3 }
  0x10   :  { %412 = shalt.err (!%p409_p7)
}
  0x11   :  { %s486_s28 = smov 256   ;;  %s487_s29 = smov 16  }
  0x12   :  { %34 = dma.hbm_to_vmem [thread:$0]  %s589_s1, 1024, %s29_s19, [#allocation6], %s486_s28, %s486_s28, %s487_s29  }
  0x13   :  { %s488_s7 = smov [#allocation2]   ;;  %s489_s9 = smov [#allocation7]  }
  0x14   :  { %s19_s8 = sshll.u32 %s488_s7, 4  ;;  %s42_s10 = sshll.u32 %s489_s9, 4  ;;  %s20_s8 = int_to_ptr.vmem [resolvable:$true] %s19_s8  ;;  %s43_s10 = int_to_ptr.vmem [resolvable:$true] %s42_s10 }
  0x15   :  { %s413_s13 = scalar_lea.hbm %s588_s0, 128 }
  0x16   :  { %p414_p8 = scmp.ne.s32.totalorder %s588_s0, %s413_s13  ;;  %p417_p9 = scmp.lt.u32.totalorder %s413_s13, %s588_s0 }
  0x18   :  { %p419_p10 = pnand %p417_p9, %p414_p8 }
  0x1a   :  { %422 = shalt.err (!%p419_p10)
}
  0x1b   :  { %s423_s1 = scalar_lea.vmem %s20_s8, 128  ;;  %p428_p12 = scmp.lt.s32.totalorder %s20_s8, %s20_s8 }
  0x1c   :  { %p424_p11 = scmp.ne.s32.totalorder %s20_s8, %s423_s1  ;;  %p429_p13 = scmp.lt.s32.totalorder %s423_s1, %s423_s1 }
  0x1e   :  { %p430_p0 = por %p429_p13, %p428_p12 }
  0x20   :  { %p431_p1 = pnand %p430_p0, %p424_p11 }
  0x22   :  { %434 = shalt.err (!%p431_p1)
}
  0x23   :  { %22 = dma.hbm_to_vmem [thread:$0]  %s588_s0, 128, %s20_s8, [#allocation3]  }
  0x24   :  { %s435_s22 = scalar_lea.hbm %s591_s3, 4096 }
  0x25   :  { %p436_p2 = scmp.ne.s32.totalorder %s591_s3, %s435_s22  ;;  %p439_p3 = scmp.lt.u32.totalorder %s435_s22, %s591_s3 }
  0x27   :  { %p441_p4 = pnand %p439_p3, %p436_p2 }
  0x29   :  { %444 = shalt.err (!%p441_p4)
}
  0x2a   :  { %s445_s27 = scalar_lea.vmem %s43_s10, 4096  ;;  %p450_p6 = scmp.lt.s32.totalorder %s43_s10, %s43_s10 }
  0x2b   :  { %p446_p5 = scmp.ne.s32.totalorder %s43_s10, %s445_s27  ;;  %p451_p7 = scmp.lt.s32.totalorder %s445_s27, %s445_s27 }
  0x2d   :  { %p452_p8 = por %p451_p7, %p450_p6 }
  0x2f   :  { %p453_p9 = pnand %p452_p8, %p446_p5 }
  0x31   :  { %456 = shalt.err (!%p453_p9)
}
  0x32   :  { %s490_s0 = smov 128   ;;  %s491_s28 = smov 8  }
  0x33   :  { %48 = dma.hbm_to_vmem [thread:$0]  %s591_s3, 4096, %s43_s10, [#allocation6], %s490_s0, %s490_s0, %s491_s28  }
  0x34   :  { %479 = dma.done.wait [#allocation3], 128  }
  0x35   :  { %480 = vsyncadd [#allocation3], 4294967168 }
  0x36   :  { %481 = dma.done.wait [#allocation6], 5120  }
  0x37   :  { %482 = vsyncadd [#allocation6], 4294962176  ;;  %v492_v0 = vmov 0.0   ;;  %v62_v1 = vld [vmem:[#allocation5 + $0x8] sm:$0xff]  ;;  %v64_v2 = vld [vmem:[#allocation5 + $0x18] sm:$0xff]  ;;  %vm81_vm0 = vcmask 261120   ;;  %v71_v62 = vlaneseq }
  0x38   :  { %149 = vmatprep.mubr.f32.mxu0 %v492_v0  ;;  %v61_v3 = vld [vmem:[#allocation5] sm:$0xff]  ;;  %v338_v4 = vpack.c.bf16 %v64_v2, %v62_v1  ;;  %v63_v5 = vld [vmem:[#allocation5 + $0x10] sm:$0xff]  ;;  %v66_v6 = vld [vmem:[#allocation5 + $0x28] sm:$0xff] }
  0x39   :  { %v68_v7 = vld [vmem:[#allocation5 + $0x38] sm:$0xff]  ;;  %v340_v8 = vpack.c.bf16 %v63_v5, %v61_v3  ;;  %v65_v10 = vld [vmem:[#allocation5 + $0x20] sm:$0xff]  ;;  %v67_v11 = vld [vmem:[#allocation5 + $0x30] sm:$0xff]  ;;  %v72_v63 = vshrl.u32 %v71_v62, 7 }
  0x3a   :  { %v342_v9 = vpack.c.bf16 %v68_v7, %v66_v6  ;;  %339 = vmatprep.subr.bf16.mxu0 %v338_v4  ;;  %v174_v12 = vld [vmem:[#allocation7 + $0x80] sm:$0xff]  ;;  %v175_v13 = vld [vmem:[#allocation7 + $0x88] sm:$0xff]  ;;  %v344_v15 = vpack.c.bf16 %v67_v11, %v65_v10  ;;  %v176_v18 = vld [vmem:[#allocation7 + $0x90] sm:$0xff]  ;;  %v268_v11 = vand.u32 127, %v71_v62 }
  0x3b   :  { %v158_v14 = vld [vmem:[#allocation7] sm:$0xff]  ;;  %341 = vmatpush1.bf16.msra.mxu0 %v340_v8  ;;  %v346_v16 = vpack.c.bf16 %v175_v13, %v174_v12  ;;  %v159_v17 = vld [vmem:[#allocation7 + $0x8] sm:$0xff]  ;;  %v177_v19 = vld [vmem:[#allocation7 + $0x98] sm:$0xff]  ;;  %v73_v0 = vsub.s32 0, %v72_v63  ;;  %v77_v2 = vsub.s32 1, %v72_v63 }
  0x3c   :  { %343 = vmatprep.subr.bf16.mxu0 %v342_v9  ;;  %v348_v20 = vpack.c.bf16 %v159_v17, %v158_v14  ;;  %v350_v21 = vpack.c.bf16 %v177_v19, %v176_v18  ;;  %v160_v22 = vld [vmem:[#allocation7 + $0x10] sm:$0xff]  ;;  %v161_v23 = vld [vmem:[#allocation7 + $0x18] sm:$0xff]  ;;  %v178_v24 = vld [vmem:[#allocation7 + $0xa0] sm:$0xff]  ;;  %vm269_vm1 = vcmp.ge.s32.totalorder %v268_v11, 24  ;;  %vm270_vm2 = vcmp.lt.s32.totalorder %v268_v11, 48 }
  0x3d   :  { %347 = vmatprep.subr.bf16.mxu1 %v346_v16  ;;  %v179_v25 = vld [vmem:[#allocation7 + $0xa8] sm:$0xff]  ;;  %v352_v26 = vpack.c.bf16 %v161_v23, %v160_v22  ;;  %v60_v27 = vld [vmem:[#allocation2] sm:$0xff]  ;;  %v162_v29 = vld [vmem:[#allocation7 + $0x20] sm:$0xff] }
  0x3e   :  { %349 = vmatpush3.bf16.msra.mxu1 %v348_v20  ;;  %v354_v28 = vpack.c.bf16 %v179_v25, %v178_v24  ;;  %v163_v30 = vld [vmem:[#allocation7 + $0x28] sm:$0xff]  ;;  %v180_v31 = vld [vmem:[#allocation7 + $0xb0] sm:$0xff]  ;;  %v181_v32 = vld [vmem:[#allocation7 + $0xb8] sm:$0xff] }
  0x3f   :  { %345 = vmatpush1.bf16.msra.mxu0 %v344_v15  ;;  %351 = vmatprep.subr.bf16.mxu1 %v350_v21  ;;  %v356_v33 = vpack.c.bf16 %v163_v30, %v162_v29  ;;  %v358_v34 = vpack.c.bf16 %v181_v32, %v180_v31  ;;  %v164_v35 = vld [vmem:[#allocation7 + $0x30] sm:$0xff]  ;;  %v165_v36 = vld [vmem:[#allocation7 + $0x38] sm:$0xff]  ;;  %v182_v37 = vld [vmem:[#allocation7 + $0xc0] sm:$0xff] }
  0x40   :  { %v183_v38 = vld [vmem:[#allocation7 + $0xc8] sm:$0xff]  ;;  %v360_v39 = vpack.c.bf16 %v165_v36, %v164_v35  ;;  %v166_v41 = vld [vmem:[#allocation7 + $0x40] sm:$0xff]  ;;  %v184_v43 = vld [vmem:[#allocation7 + $0xd0] sm:$0xff] }
  0x41   :  { %v362_v40 = vpack.c.bf16 %v183_v38, %v182_v37  ;;  %v167_v42 = vld [vmem:[#allocation7 + $0x48] sm:$0xff]  ;;  %v185_v44 = vld [vmem:[#allocation7 + $0xd8] sm:$0xff]  ;;  %v168_v47 = vld [vmem:[#allocation7 + $0x50] sm:$0xff] }
  0x42   :  { %301 = vmatmul.mubr.msk.f32.vlgmr.msra.gmra.mrb[0].mxu0 %vm81_vm0, %v60_v27  ;;  %353 = vmatpush3.bf16.msra.mxu1 %v352_v26  ;;  %v364_v45 = vpack.c.bf16 %v167_v42, %v166_v41  ;;  %v366_v46 = vpack.c.bf16 %v185_v44, %v184_v43  ;;  %v169_v48 = vld [vmem:[#allocation7 + $0x58] sm:$0xff]  ;;  %v186_v49 = vld [vmem:[#allocation7 + $0xe0] sm:$0xff]  ;;  %v187_v50 = vld [vmem:[#allocation7 + $0xe8] sm:$0xff] }
  0x43   :  { %355 = vmatprep.subr.bf16.mxu1 %v354_v28  ;;  %v368_v51 = vpack.c.bf16 %v169_v48, %v168_v47  ;;  %v370_v52 = vpack.c.bf16 %v187_v50, %v186_v49  ;;  %v170_v53 = vld [vmem:[#allocation7 + $0x60] sm:$0xff]  ;;  %v171_v54 = vld [vmem:[#allocation7 + $0x68] sm:$0xff]  ;;  %v188_v56 = vld [vmem:[#allocation7 + $0xf0] sm:$0xff] }
  0x44   :  { %v372_v55 = vpack.c.bf16 %v171_v54, %v170_v53  ;;  %v189_v57 = vld [vmem:[#allocation7 + $0xf8] sm:$0xff]  ;;  %v172_v59 = vld [vmem:[#allocation7 + $0x70] sm:$0xff]  ;;  %vm566_vm3 = vmand %vm269_vm1, %vm270_vm2 }
  0x45   :  { %v374_v58 = vpack.c.bf16 %v189_v57, %v188_v56  ;;  %v173_v60 = vld [vmem:[#allocation7 + $0x78] sm:$0xff] }
  0x46   :  { %357 = vmatpush3.bf16.msra.mxu1 %v356_v33  ;;  %v376_v61 = vpack.c.bf16 %v173_v60, %v172_v59  ;;  %v69_v1 = vld [vmem:[%s590_s2] sm:$0x3]  ;;  %s493_s2 = smov [#allocation8]  }
  0x47   :  { %359 = vmatprep.subr.bf16.mxu1 %v358_v34  ;;  %v74_v3 = vrot.slane %v69_v1, %v73_v0  ;;  %v78_v4 = vrot.slane %v69_v1, %v77_v2  ;;  %v302_v14 = vld [vmem:[%s592_s4] ss:$0 sm:$0xff]  ;;  %s291_s4 = sshll.u32 %s493_s2, 4  ;;  %s292_s4 = int_to_ptr.vmem [resolvable:$true] %s291_s4 }
  0x48   :  { %s457_s9 = scalar_lea.vmem %s292_s4, 128  ;;  %p462_p11 = scmp.lt.s32.totalorder %s292_s4, %s292_s4 }
  0x49   :  { %p458_p10 = scmp.ne.s32.totalorder %s292_s4, %s457_s9  ;;  %p463_p12 = scmp.lt.s32.totalorder %s457_s9, %s457_s9 }
  0x4a   :  { %361 = vmatpush3.bf16.msra.mxu1 %v360_v39 }
  0x4b   :  { %363 = vmatprep.subr.bf16.mxu1 %v362_v40  ;;  %p464_p13 = por %p463_p12, %p462_p11 }
  0x4d   :  { %p465_p0 = pnand %p464_p13, %p458_p10 }
  0x4e   :  { %365 = vmatpush3.bf16.msra.mxu1 %v364_v45 }
  0x4f   :  { %367 = vmatprep.subr.bf16.mxu1 %v366_v46 }
  0x52   :  { %369 = vmatpush3.bf16.msra.mxu1 %v368_v51 }
  0x53   :  { %371 = vmatprep.subr.bf16.mxu1 %v370_v52 }
  0x56   :  { %373 = vmatpush3.bf16.msra.mxu1 %v372_v55 }
  0x57   :  { %375 = vmatprep.subr.bf16.mxu1 %v374_v58 }
  0x5a   :  { %377 = vmatpush3.bf16.msra.mxu1 %v376_v61 }
 0x115   :  { %v151_v5 = vpop.f32.mrb[0].mxu0 }
 0x116   :  { %v152_v6 = vadd.f32 %v151_v5, %v74_v3  ;;  %v153_v7 = vpop.f32.mrb[1].mxu0 }
 0x117   :  { %v154_v8 = vadd.f32 %v153_v7, %v78_v4 }
 0x118   :  { %v156_v10 = vmax.f32 %v152_v6, 0.0 }
 0x119   :  { %v157_v9 = vmax.f32 %v154_v8, 0.0 }
 0x11b   :  { %261 = vmatprep.mubr.f32.mxu1 %v157_v9 }
 0x11c   :  { %262 = vmatmul.mubr.f32.vlgmr.msra.gmra.mrb[0].mxu1 %v156_v10 }
 0x1ef   :  { %v335_v12 = vpop.f32.mrb[0].mxu1 }
 0x1f0   :  { %v336_v13 = vpop.f32.mrb[1].mxu1 }
 0x1f1   :  { %v337_v15 = vadd.f32 %v336_v13, %v335_v12 }
 0x1f3   :  { %v264_v17 = vadd.f32 %v337_v15, %v302_v14 }
 0x1f5   :  { %v272_v18 = vsel %vm566_vm3, %v264_v17, -1e+30 }
 0x1f6   :  { %273 = vmax.xlane.f32.xlu0 %v272_v18 }
 0x283   :  { %v274_v19 = vpop.xlane.xlu0 %273 }
 0x284   :  { %v275_v20 = vsub.f32 %v272_v18, %v274_v19 }
 0x286   :  { %v276_v21 = vmul.f32 1.442695, %v275_v20 }
 0x288   :  { %387 = vpow2.f32 %v276_v21 }
 0x292   :  { %v388_v22 = vpop.eup %387 }
 0x293   :  { %v278_v23 = vsel %vm566_vm3, %v388_v22, 0.0 }
 0x294   :  { %279 = vadd.xlane.f32.xlu0 %v278_v23 }
 0x321   :  { %v280_v24 = vpop.xlane.xlu0 %279 }
 0x322   :  { %389 = vrcp.f32 %v280_v24 }
 0x32c   :  { %v390_v25 = vpop.eup %389 }
 0x32d   :  { %v282_v26 = vmul.f32 %v390_v25, %v278_v23 }
 0x32f   :  { %v283_v27 = vsel %vm566_vm3, %v282_v26, %v264_v17 }
 0x330   :  { %284 = vst [vmem:[#allocation8] sm:$0xff] %v283_v27 }
 0x331   :  { %468 = shalt.err (!%p465_p0)
}
 0x332   :  { %s469_s12 = scalar_lea.hbm %s593_s5, 128 }
 0x333   :  { %p470_p1 = scmp.ne.s32.totalorder %s593_s5, %s469_s12  ;;  %p473_p2 = scmp.lt.u32.totalorder %s469_s12, %s593_s5 }
 0x335   :  { %p475_p3 = pnand %p473_p2, %p470_p1 }
 0x337   :  { %478 = shalt.err (!%p475_p3)
}
 0x338   :  { %294 = dma.vmem_to_hbm [thread:$0]  %s292_s4, 128, %s593_s5, [#allocation4]  }
 0x339   :  { %483 = dma.done.wait [#allocation4], 128  }
 0x33a   :  { %484 = vsyncadd [#allocation4], 4294967168 }
 0x33b   :  { %298 = vsyncpa [#allocation3], 1 }
 0x33c   :  { %299 = vsyncpa [#allocation6], 1 }
 0x33d   :  { %300 = vsyncpa [#allocation4], 1 }

</bundles_post_ra>
